<compile_context>
chip_gen: v5e
topology: v5e:2x2
jax: 0.10.0
libtpu: 0.0.40
codegen_flags: <defaults>
</compile_context>

<pallas_src>
import functools

import jax
import jax.numpy as jnp
from jax.experimental import pallas as pl
from jax.experimental.pallas import tpu as pltpu

PAD = 128          # lane width of the in-kernel activation
MAX_BLOCK_M = 2048  # batch-tile cap (1 MiB of f32 activation at 128 lanes)


def _round_up(x, m):
    return ((x + m - 1) // m) * m


def _mlp_kernel(x_ref, p_ref, o_ref, *, n_layers, in_dim, emb_dim):
    """Fused MLP over one batch tile.

    x_ref: (block_m, in_dim)  input tile at natural width.
    p_ref: (n_layers, PAD, PAD) parameter slab. Layer i's weight occupies rows
           [0, d_in_i), its bias is folded into row PAD-1, and
           p_ref[i, PAD-1, PAD-1] == 1 keeps a constant-ones column alive through
           every ReLU (relu(1) == 1), which carries the bias of the next layer.
    o_ref: (block_m, emb_dim) output tile at natural width.
    """
    cdt = p_ref.dtype                    # weight storage/compute dtype (f32 or bf16)
    block_m = x_ref.shape[0]

    # Layer 0: contract directly against the un-padded input; its bias is added
    # as a (1, PAD) broadcast (the ones-column trick needs a ones column in the
    # *input*, which we no longer DMA from HBM).
    w0 = p_ref[0, :in_dim, :]            # (in_dim, PAD)
    b0 = p_ref[0, PAD - 1:PAD, :]        # (1, PAD) bias row of layer 0
    h = jnp.dot(x_ref[...].astype(cdt), w0, preferred_element_type=jnp.float32)
    h = jnp.maximum(h + b0.astype(jnp.float32), 0.0)

    if n_layers > 1:
        # Materialize the constant-ones column (lane PAD-1) so the folded biases
        # of layers 1..n-1 get picked up by the matmuls below.
        lane = jax.lax.broadcasted_iota(jnp.int32, (block_m, PAD), 1)
        h = jnp.where(lane == PAD - 1, jnp.float32(1.0), h)

    for i in range(1, n_layers):
        h = jnp.maximum(
            jnp.dot(h.astype(cdt), p_ref[i], preferred_element_type=jnp.float32),
            0.0,
        )

    o_ref[...] = h[:, :emb_dim].astype(o_ref.dtype)


def _pack_param_slab(weights, biases, dtype):
    """Pack all layers into one (n_layers, PAD, PAD) lane-dense slab."""
    slabs = []
    for w, b in zip(weights, biases):
        d_in, d_out = w.shape
        s = jnp.zeros((PAD, PAD), jnp.float32)
        s = s.at[:d_in, :d_out].set(w.astype(jnp.float32))
        s = s.at[PAD - 1, :d_out].set(jnp.reshape(b, (-1,)).astype(jnp.float32))
        s = s.at[PAD - 1, PAD - 1].set(1.0)  # propagate the ones column
        slabs.append(s)
    return jnp.stack(slabs, axis=0).astype(dtype)


def _choose_block_m(batch):
    # (a) aim for >= 2 grid steps so the "parallel" batch axis shards across
    #     both TensorCores on v7x,
    # (b) cap tiles at MAX_BLOCK_M rows to amortize the ~0.35us per-step
    #     overhead while staying tiny vs VMEM on all generations.
    n_steps = max(2, pl.cdiv(batch, MAX_BLOCK_M))
    return max(8, min(MAX_BLOCK_M, _round_up(pl.cdiv(batch, n_steps), 8)))


def tuple_embedding_forward(x, weights, biases, *, block_m=None, use_pallas=None,
                            bf16_params=False):
    """TupleEmbedding forward: x -> [(Linear+ReLU) x (n_layer-1)] -> Linear+ReLU.

    x:       (batch, in_dim) float32 (bf16 also accepted; output matches x.dtype)
    weights: list of (d_in, d_out) arrays (already transposed vs torch's (out, in))
    biases:  list of (d_out,) arrays
    """
    batch, in_dim = x.shape
    n_layers = len(weights)
    emb_dim = weights[-1].shape[1]
    out_dtype = x.dtype

    if batch == 0:
        return jnp.zeros((0, emb_dim), out_dtype)

    max_dim = max([in_dim] + [w.shape[1] for w in weights])
    assert max_dim <= PAD - 1, "feature dims must fit in 127 lanes (lane 127 = ones)"
    # TODO(synk): only activation='relu' is wired up; the folded-bias ones column
    # relies on f(1) == 1, which breaks for gelu/silu variants of the module.

    if use_pallas is None:
        # Single-tile problems have no pipelining to win; plain XLA beats the
        # kernel launch + per-step overhead there.
        use_pallas = batch > MAX_BLOCK_M
    if not use_pallas:
        h = x.astype(jnp.float32)
        for w, b in zip(weights, biases):
            h = jnp.maximum(
                h @ w.astype(jnp.float32)
                + jnp.reshape(b, (1, -1)).astype(jnp.float32), 0.0)
        return h.astype(out_dtype)

    param_dtype = jnp.bfloat16 if bf16_params else jnp.float32
    param_slab = _pack_param_slab(weights, biases, param_dtype)

    if block_m is None:
        block_m = _choose_block_m(batch)
    block_m = max(8, _round_up(block_m, 8))
    padded_batch = _round_up(batch, block_m)
    grid = (padded_batch // block_m,)

    # Pad only the batch (row) axis, and only when it is ragged; features stay at
    # their natural width -- the 128-lane padding happens inside the kernel.
    if padded_batch != batch:
        x_in = jnp.pad(x, ((0, padded_batch - batch), (0, 0)))
    else:
        x_in = x

    # VMEM budget: double-buffered in/out tiles + double-buffered param slab +
    # headroom for the f32 intermediates kept live by the body. Far below v7x's
    # 64 MiB even at block_m = 2048.
    in_bytes = block_m * in_dim * x_in.dtype.itemsize
    out_bytes = block_m * emb_dim * out_dtype.itemsize
    slab_bytes = param_slab.size * param_slab.dtype.itemsize
    body_bytes = 4 * block_m * PAD * 4
    vmem_need = 2 * (in_bytes + out_bytes + slab_bytes) + body_bytes
    vmem_limit = int(min(max(2 * vmem_need, 8 << 20), 48 << 20))

    cost = pl.CostEstimate(
        flops=2 * padded_batch * (in_dim * PAD + (n_layers - 1) * PAD * PAD),
        transcendentals=0,
        bytes_accessed=(padded_batch * in_dim * x_in.dtype.itemsize
                        + slab_bytes
                        + padded_batch * emb_dim * out_dtype.itemsize),
    )

    kernel = functools.partial(
        _mlp_kernel, n_layers=n_layers, in_dim=in_dim, emb_dim=emb_dim)

    fn = pl.pallas_call(
        kernel,
        out_shape=jax.ShapeDtypeStruct((padded_batch, emb_dim), out_dtype),
        grid_spec=pltpu.PrefetchScalarGridSpec(
            num_scalar_prefetch=0,
            grid=grid,
            in_specs=[
                # natural-width activation tile (last dim == full array dim)
                pl.BlockSpec((block_m, in_dim), lambda i: (i, 0)),
                # constant index_map: slab DMA'd once, resident across all steps
                pl.BlockSpec((n_layers, PAD, PAD), lambda i: (0, 0, 0)),
            ],
            out_specs=pl.BlockSpec((block_m, emb_dim), lambda i: (i, 0)),
        ),
        compiler_params=pltpu.CompilerParams(
            dimension_semantics=("parallel",),
            vmem_limit_bytes=vmem_limit,
        ),
        cost_estimate=cost,
    )
    out = fn(x_in, param_slab)
    if padded_batch != batch:
        out = out[:batch]
    return out


def init_tuple_embedding_params(key, n_layer, in_dim, embedding_dim):
    """Deterministic init mirroring the torch module's shapes.

    Hidden layers: Linear(last, in_dim//2) with bias filled to 0.0 (as in __init__).
    Final layer:   Linear(last, embedding_dim) with default (non-zero) bias.
    Weights are stored as (in, out) for x @ W.
    """
    hid_dim = in_dim // 2
    weights, biases = [], []
    last = in_dim
    for _ in range(n_layer - 1):
        key, wk = jax.random.split(key)
        bound = 1.0 / jnp.sqrt(jnp.float32(last))
        w = jax.random.uniform(wk, (last, hid_dim), jnp.float32, -bound, bound)
        b = jnp.zeros((hid_dim,), jnp.float32)  # torch: bias.data.fill_(0.0)
        weights.append(w)
        biases.append(b)
        last = hid_dim
    key, wk, bk = jax.random.split(key, 3)
    bound = 1.0 / jnp.sqrt(jnp.float32(last))
    w = jax.random.uniform(wk, (last, embedding_dim), jnp.float32, -bound, bound)
    b = jax.random.uniform(bk, (embedding_dim,), jnp.float32, -bound, bound)
    weights.append(w)
    biases.append(b)
    return weights, biases


def reference_forward(x, weights, biases):
    h = x.astype(jnp.float32)
    for w, b in zip(weights, biases):
        h = jnp.maximum(h @ w + jnp.reshape(b, (1, -1)), 0.0)
    return h


if __name__ == "__main__":
    n_layer = 3
    in_dim = 32
    embedding_dim = 32

    key = jax.random.PRNGKey(0)
    key, pk = jax.random.split(key)
    weights, biases = init_tuple_embedding_params(pk, n_layer, in_dim, embedding_dim)

    # 1) Small batch, Pallas path forced (exercises the kernel at grid=(1,)).
    key, xk = jax.random.split(key)
    x_small = jax.random.normal(xk, (8, in_dim), jnp.float32)
    out_small = jax.block_until_ready(
        tuple_embedding_forward(x_small, weights, biases, use_pallas=True))
    ref_small = reference_forward(x_small, weights, biases)
    assert out_small.shape == (8, embedding_dim)
    assert jnp.allclose(out_small, ref_small, atol=1e-5, rtol=1e-5), "small-batch mismatch"

    # 1b) Non-zero biases in every layer (exercises both bias paths in the kernel).
    rand_biases = []
    for b in biases:
        key, bk = jax.random.split(key)
        rand_biases.append(jax.random.normal(bk, b.shape, jnp.float32))
    out_rb = jax.block_until_ready(
        tuple_embedding_forward(x_small, weights, rand_biases, use_pallas=True))
    assert jnp.allclose(out_rb, reference_forward(x_small, weights, rand_biases),
                        atol=1e-5, rtol=1e-5), "random-bias mismatch"

    # 2) Ragged multi-tile batch, auto path (Pallas, grid >= 2, row padding + slice).
    key, xk = jax.random.split(key)
    x_big = jax.random.normal(xk, (2051, in_dim), jnp.float32)
    out_big = jax.block_until_ready(tuple_embedding_forward(x_big, weights, biases))
    ref_big = reference_forward(x_big, weights, biases)
    assert out_big.shape == (2051, embedding_dim)
    assert jnp.allclose(out_big, ref_big, atol=1e-5, rtol=1e-5), "large-batch mismatch"

    # 3) Small batch via the default path (plain-XLA fast path, grid would be 1).
    out_fast = jax.block_until_ready(tuple_embedding_forward(x_small, weights, biases))
    assert jnp.allclose(out_fast, ref_small, atol=1e-5, rtol=1e-5), "fast-path mismatch"

    print("KERNEL_OK")
</pallas_src>

<mosaic_0001>
module attributes {stable_mosaic.version = 11 : i64} {
  func.func @_mlp_kernel(%arg0: i32, %arg1: memref<8x32xf32, #tpu.memory_space<vmem>>, %arg2: memref<3x128x128xf32, #tpu.memory_space<vmem>>, %arg3: memref<8x32xf32, #tpu.memory_space<vmem>>) attributes {dimension_semantics = [#tpu.dimension_semantics<parallel>], iteration_bounds = array<i64: 1>, scalar_prefetch = 0 : i64, scratch_operands = 0 : i64, tpu.core_type = #tpu.core_type<tc>, window_params = [{transform_indices = @transform_0, window_bounds = array<i64: 8, 32>}, {pipeline_mode = #tpu.pipeline_mode<synchronous>, transform_indices = @transform_1, window_bounds = array<i64: 3, 128, 128>}, {transform_indices = @transform_2, window_bounds = array<i64: 8, 32>}]} {
    %c0 = arith.constant 0 : index
    %c0_0 = arith.constant 0 : index
    %c0_1 = arith.constant 0 : index
    %0 = vector.load %arg2[%c0, %c0_0, %c0_1] : memref<3x128x128xf32, #tpu.memory_space<vmem>>, vector<1x32x128xf32>
    %1 = vector.shape_cast %0 : vector<1x32x128xf32> to vector<32x128xf32>
    %c0_2 = arith.constant 0 : index
    %c127 = arith.constant 127 : index
    %c0_3 = arith.constant 0 : index
    %2 = vector.load %arg2[%c0_2, %c127, %c0_3] : memref<3x128x128xf32, #tpu.memory_space<vmem>>, vector<1x1x128xf32>
    %3 = vector.shape_cast %2 : vector<1x1x128xf32> to vector<1x128xf32>
    %c0_4 = arith.constant 0 : index
    %c0_5 = arith.constant 0 : index
    %4 = vector.load %arg1[%c0_4, %c0_5] : memref<8x32xf32, #tpu.memory_space<vmem>>, vector<8x32xf32>
    %cst = arith.constant dense<0.000000e+00> : vector<8x128xf32>
    %5 = tpu.matmul %4, %1, %cst {dimension_numbers = #tpu.dot_dimension_numbers<[1], [0], [0], [1], [0, 0, 1, 1], [], []>} : vector<8x32xf32>, vector<32x128xf32>, vector<8x128xf32> -> vector<8x128xf32>
    %6 = vector.broadcast %3 : vector<1x128xf32> to vector<8x128xf32>
    %7 = arith.addf %5, %6 : vector<8x128xf32>
    %cst_6 = arith.constant 0.000000e+00 : f32
    %8 = vector.broadcast %cst_6 : f32 to vector<8x128xf32>
    %9 = arith.maximumf %7, %8 : vector<8x128xf32>
    %10 = tpu.iota {dimensions = array<i32: 1>} : vector<8x128xi32>
    %c127_i32 = arith.constant 127 : i32
    %11 = vector.broadcast %c127_i32 : i32 to vector<8x128xi32>
    %12 = arith.cmpi eq, %10, %11 : vector<8x128xi32>
    %cst_7 = arith.constant 1.000000e+00 : f32
    %13 = vector.broadcast %cst_7 : f32 to vector<8x128xf32>
    %14 = arith.select %12, %13, %9 : vector<8x128xi1>, vector<8x128xf32>
    %c1 = arith.constant 1 : index
    %c0_8 = arith.constant 0 : index
    %c0_9 = arith.constant 0 : index
    %15 = vector.load %arg2[%c1, %c0_8, %c0_9] : memref<3x128x128xf32, #tpu.memory_space<vmem>>, vector<1x128x128xf32>
    %16 = vector.shape_cast %15 : vector<1x128x128xf32> to vector<128x128xf32>
    %cst_10 = arith.constant dense<0.000000e+00> : vector<8x128xf32>
    %17 = tpu.matmul %14, %16, %cst_10 {dimension_numbers = #tpu.dot_dimension_numbers<[1], [0], [0], [1], [0, 0, 1, 1], [], []>} : vector<8x128xf32>, vector<128x128xf32>, vector<8x128xf32> -> vector<8x128xf32>
    %cst_11 = arith.constant 0.000000e+00 : f32
    %18 = vector.broadcast %cst_11 : f32 to vector<8x128xf32>
    %19 = arith.maximumf %17, %18 : vector<8x128xf32>
    %c2 = arith.constant 2 : index
    %c0_12 = arith.constant 0 : index
    %c0_13 = arith.constant 0 : index
    %20 = vector.load %arg2[%c2, %c0_12, %c0_13] : memref<3x128x128xf32, #tpu.memory_space<vmem>>, vector<1x128x128xf32>
    %21 = vector.shape_cast %20 : vector<1x128x128xf32> to vector<128x128xf32>
    %cst_14 = arith.constant dense<0.000000e+00> : vector<8x128xf32>
    %22 = tpu.matmul %19, %21, %cst_14 {dimension_numbers = #tpu.dot_dimension_numbers<[1], [0], [0], [1], [0, 0, 1, 1], [], []>} : vector<8x128xf32>, vector<128x128xf32>, vector<8x128xf32> -> vector<8x128xf32>
    %cst_15 = arith.constant 0.000000e+00 : f32
    %23 = vector.broadcast %cst_15 : f32 to vector<8x128xf32>
    %24 = arith.maximumf %22, %23 : vector<8x128xf32>
    %25 = vector.extract_strided_slice %24 {offsets = [0, 0], sizes = [8, 32], strides = [1, 1]} : vector<8x128xf32> to vector<8x32xf32>
    %c0_16 = arith.constant 0 : index
    %c0_17 = arith.constant 0 : index
    %26 = vector.load %arg3[%c0_16, %c0_17] : memref<8x32xf32, #tpu.memory_space<vmem>>, vector<8x32xf32>
    tpu.vector_store %arg3[%c0_16, %c0_17], %25 {strides = array<i32>} : memref<8x32xf32, #tpu.memory_space<vmem>>, vector<8x32xf32>,
    return
  }
  func.func @transform_0(%arg0: i32) -> (i32, i32) {
    %c0_i32 = arith.constant 0 : i32
    %c0_i32_0 = arith.constant 0 : i32
    return %arg0, %c0_i32 : i32, i32
  }
  func.func @transform_1(%arg0: i32) -> (i32, i32, i32) {
    %c0_i32 = arith.constant 0 : i32
    %c0_i32_0 = arith.constant 0 : i32
    %c0_i32_1 = arith.constant 0 : i32
    %c0_i32_2 = arith.constant 0 : i32
    return %c0_i32, %c0_i32_0, %c0_i32_1 : i32, i32, i32
  }
  func.func @transform_2(%arg0: i32) -> (i32, i32) {
    %c0_i32 = arith.constant 0 : i32
    %c0_i32_0 = arith.constant 0 : i32
    return %arg0, %c0_i32 : i32, i32
  }
}

</mosaic_0001>

<bundles_post_ra>
// kernel: tpu_custom_call.1
= control target key start
LH: loop header
LB: loop body
LE: loop exit
PB: predicated region body
PF: predicated region fallthrough
CT: control target
= control target key end

     0   :  { %7 = vsyncpa [#allocation3], 0  ;;  %s289_s0 = inlined_call_operand.hbm [shape: f32[8,32], index: 0, kind: input, shape index: {}]   ;;  %s290_s1 = inlined_call_operand.hbm [shape: f32[3,128,128], index: 1, kind: input, shape index: {}]   ;;  %s291_s2 = inlined_call_operand.hbm [shape: f32[8,32], index: 2, kind: output, shape index: {}]  }
   0x1   :  { %8 = vsyncpa [#allocation6], 0 }
   0x2   :  { %9 = vsyncpa [#allocation4], 0  ;;  %s15_s11 = sshll.u32 %s289_s0, 4  ;;  %s258_s12 = smov [#allocation2]   ;;  %s16_s11 = int_to_ptr.hbm [resolvable:$true] %s15_s11 }
   0x3   :  { %s17_s13 = sshll.u32 %s258_s12, 4  ;;  %s25_s16 = sshll.u32 %s290_s1, 4  ;;  %s18_s13 = int_to_ptr.vmem [resolvable:$true] %s17_s13  ;;  %s26_s16 = int_to_ptr.hbm [resolvable:$true] %s25_s16 }
   0x4   :  { %20 = dma.hbm_to_vmem [thread:$0]  %s16_s11, 128, %s18_s13, [#allocation3]  }
   0x5   :  { %s259_s17 = smov [#allocation5]   ;;  %s260_s19 = smov 128  }
   0x6   :  { %s27_s18 = sshll.u32 %s259_s17, 4  ;;  %s261_s20 = smov 8   ;;  %s28_s18 = int_to_ptr.vmem [resolvable:$true] %s27_s18 }
   0x7   :  { %33 = dma.hbm_to_vmem [thread:$0]  %s26_s16, 6144, %s28_s18, [#allocation6], %s260_s19, %s260_s19, %s261_s20  }
   0x8   :  { %252 = dma.done.wait [#allocation3], 128  }
   0x9   :  { %253 = vsyncadd [#allocation3], 4294967168 }
   0xa   :  { %254 = dma.done.wait [#allocation6], 6144  }
   0xb   :  { %255 = vsyncadd [#allocation6], 4294961152  ;;  %v45_v0 = vld [vmem:[#allocation5 + $0x18] sm:$0xff]  ;;  %v44_v1 = vld [vmem:[#allocation5 + $0x10] sm:$0xff]  ;;  %vm49_vm0 = vcmask 261120   ;;  %v74_v32 = vlaneseq  ;;  %s262_s0 = smov [#allocation7]  }
   0xc   :  { %65 = vmatpush.msra.mxu0 %v45_v0  ;;  %v94_v2 = vld [vmem:[#allocation5 + $0xf8] sm:$0xff]  ;;  %v43_v3 = vld [vmem:[#allocation5 + $0x8] sm:$0xff]  ;;  %v93_v4 = vld [vmem:[#allocation5 + $0xf0] sm:$0xff]  ;;  %s160_s1 = sshll.u32 %s262_s0, 4  ;;  %s162_s23 = sshll.u32 %s291_s2, 4  ;;  %s161_s1 = int_to_ptr.vmem [resolvable:$true] %s160_s1  ;;  %s163_s23 = int_to_ptr.hbm [resolvable:$true] %s162_s23 }
   0xd   :  { %95 = vmatpush.msra.mxu1 %v94_v2  ;;  %v92_v5 = vld [vmem:[#allocation5 + $0xe8] sm:$0xff]  ;;  %v42_v6 = vld [vmem:[#allocation5] sm:$0xff]  ;;  %v47_v7 = vld [vmem:[#allocation2] sm:$0xff]  ;;  %v75_v36 = vand.u32 127, %v74_v32 }
   0xe   :  { %66 = vmatpush.msra.mxu0 %v44_v1  ;;  %v91_v8 = vld [vmem:[#allocation5 + $0xe0] sm:$0xff]  ;;  %v90_v9 = vld [vmem:[#allocation5 + $0xd8] sm:$0xff]  ;;  %v89_v10 = vld [vmem:[#allocation5 + $0xd0] sm:$0xff] }
   0xf   :  { %96 = vmatpush.msra.mxu1 %v93_v4  ;;  %v88_v11 = vld [vmem:[#allocation5 + $0xc8] sm:$0xff]  ;;  %v87_v12 = vld [vmem:[#allocation5 + $0xc0] sm:$0xff]  ;;  %v86_v13 = vld [vmem:[#allocation5 + $0xb8] sm:$0xff]  ;;  %vm76_vm1 = vcmp.eq.s32.totalorder %v75_v36, 127 }
  0x10   :  { %67 = vmatpush.msra.mxu0 %v43_v3  ;;  %v85_v14 = vld [vmem:[#allocation5 + $0xb0] sm:$0xff]  ;;  %v84_v15 = vld [vmem:[#allocation5 + $0xa8] sm:$0xff]  ;;  %v83_v16 = vld [vmem:[#allocation5 + $0xa0] sm:$0xff] }
  0x11   :  { %97 = vmatpush.msra.mxu1 %v92_v5  ;;  %v82_v17 = vld [vmem:[#allocation5 + $0x98] sm:$0xff]  ;;  %v81_v18 = vld [vmem:[#allocation5 + $0x90] sm:$0xff]  ;;  %v80_v19 = vld [vmem:[#allocation5 + $0x88] sm:$0xff] }
  0x12   :  { %68 = vmatpush.msra.mxu0 %v42_v6  ;;  %v79_v20 = vld [vmem:[#allocation5 + $0x80] sm:$0xff]  ;;  %v132_v21 = vld [vmem:[#allocation5 + $0x178] sm:$0xff]  ;;  %v131_v22 = vld [vmem:[#allocation5 + $0x170] sm:$0xff] }
  0x13   :  { %173 = vmatmul.msk.f32.vlgmr.msra.gmra.mxu0 %vm49_vm0, %v47_v7  ;;  %98 = vmatpush.msra.mxu1 %v91_v8  ;;  %v130_v23 = vld [vmem:[#allocation5 + $0x168] sm:$0xff]  ;;  %v129_v24 = vld [vmem:[#allocation5 + $0x160] sm:$0xff]  ;;  %v128_v25 = vld [vmem:[#allocation5 + $0x158] sm:$0xff] }
  0x14   :  { %133 = vmatpush.msra.mxu2 %v132_v21  ;;  %v127_v26 = vld [vmem:[#allocation5 + $0x150] sm:$0xff]  ;;  %v126_v27 = vld [vmem:[#allocation5 + $0x148] sm:$0xff]  ;;  %v125_v28 = vld [vmem:[#allocation5 + $0x140] sm:$0xff] }
  0x15   :  { %99 = vmatpush.msra.mxu1 %v90_v9  ;;  %v124_v29 = vld [vmem:[#allocation5 + $0x138] sm:$0xff]  ;;  %v123_v30 = vld [vmem:[#allocation5 + $0x130] sm:$0xff]  ;;  %v122_v31 = vld [vmem:[#allocation5 + $0x128] sm:$0xff] }
  0x16   :  { %134 = vmatpush.msra.mxu2 %v131_v22  ;;  %v121_v33 = vld [vmem:[#allocation5 + $0x120] sm:$0xff]  ;;  %v120_v34 = vld [vmem:[#allocation5 + $0x118] sm:$0xff]  ;;  %v119_v37 = vld [vmem:[#allocation5 + $0x110] sm:$0xff] }
  0x17   :  { %100 = vmatpush.msra.mxu1 %v89_v10  ;;  %v179_v35 = vld [vmem:[#allocation5 + $0x7f] ss:$0 sm:$0xff]  ;;  %v118_v42 = vld [vmem:[#allocation5 + $0x108] sm:$0xff]  ;;  %v117_v43 = vld [vmem:[#allocation5 + $0x100] sm:$0xff] }
  0x18   :  { %135 = vmatpush.msra.mxu2 %v130_v23 }
  0x19   :  { %101 = vmatpush.msra.mxu1 %v88_v11 }
  0x1a   :  { %136 = vmatpush.msra.mxu2 %v129_v24 }
  0x1b   :  { %102 = vmatpush.msra.mxu1 %v87_v12 }
  0x1c   :  { %137 = vmatpush.msra.mxu2 %v128_v25 }
  0x1d   :  { %103 = vmatpush.msra.mxu1 %v86_v13 }
  0x1e   :  { %138 = vmatpush.msra.mxu2 %v127_v26 }
  0x1f   :  { %104 = vmatpush.msra.mxu1 %v85_v14 }
  0x20   :  { %139 = vmatpush.msra.mxu2 %v126_v27 }
  0x21   :  { %105 = vmatpush.msra.mxu1 %v84_v15 }
  0x22   :  { %140 = vmatpush.msra.mxu2 %v125_v28 }
  0x23   :  { %106 = vmatpush.msra.mxu1 %v83_v16 }
  0x24   :  { %141 = vmatpush.msra.mxu2 %v124_v29 }
  0x25   :  { %107 = vmatpush.msra.mxu1 %v82_v17 }
  0x26   :  { %142 = vmatpush.msra.mxu2 %v123_v30 }
  0x27   :  { %108 = vmatpush.msra.mxu1 %v81_v18 }
  0x28   :  { %143 = vmatpush.msra.mxu2 %v122_v31 }
  0x29   :  { %109 = vmatpush.msra.mxu1 %v80_v19 }
  0x2a   :  { %144 = vmatpush.msra.mxu2 %v121_v33 }
  0x2b   :  { %110 = vmatpush.msra.mxu1 %v79_v20 }
  0x2c   :  { %145 = vmatpush.msra.mxu2 %v120_v34 }
  0x2e   :  { %146 = vmatpush.msra.mxu2 %v119_v37 }
  0x30   :  { %147 = vmatpush.msra.mxu2 %v118_v42 }
  0x32   :  { %148 = vmatpush.msra.mxu2 %v117_v43 }
  0x90   :  { %v70_v38 = vpop.f32.mrf.mxu0 }
  0x91   :  { %v71_v39 = vadd.f32 %v179_v35, %v70_v38 }
  0x93   :  { %v73_v40 = vmax.f32 %v71_v39, 0.0 }
  0x95   :  { %v77_v41 = vsel %vm76_vm1, 1.0, %v73_v40 }
  0x96   :  { %111 = vmatmul.f32.vlgmr.msra.gmra.mxu1 %v77_v41 }
 0x113   :  { %v112_v44 = vpop.f32.mrf.mxu1 }
 0x114   :  { %v115_v45 = vmax.f32 %v112_v44, 0.0 }
 0x116   :  { %149 = vmatmul.f32.vlgmr.msra.gmra.mxu2 %v115_v45 }
 0x199   :  { %v150_v46 = vpop.f32.mrf.mxu2 }
 0x19a   :  { %v153_v47 = vmax.f32 %v150_v46, 0.0 }
 0x19c   :  { %154 = vst.msk [vmem:[#allocation7] sm:$0xff] %vm49_vm0, %v153_v47 }
 0x19d   :  { %165 = dma.vmem_to_hbm [thread:$0]  %s161_s1, 128, %s163_s23, [#allocation4]  }
 0x19e   :  { %256 = dma.done.wait [#allocation4], 128  }
 0x19f   :  { %257 = vsyncadd [#allocation4], 4294967168 }
 0x1a0   :  { %170 = vsyncpa [#allocation3], 1 }
 0x1a1   :  { %171 = vsyncpa [#allocation6], 1 }
 0x1a2   :  { %172 = vsyncpa [#allocation4], 1 }

</bundles_post_ra>
